<compile_context>
chip_gen: v7x
topology: tpu7x:2x2x1
jax: 0.10.0
libtpu: 0.0.40
codegen_flags: <defaults>
</compile_context>

<pallas_src>
import functools

import jax
import jax.numpy as jnp
from jax import lax
from jax.experimental import pallas as pl
from jax.experimental.pallas import tpu as pltpu


_NEG_SLOPE = 0.01          # nn.LeakyReLU() default
_UNROLL_MAX_LAYERS = 8     # static unroll for small stacks, fori_loop(unroll=2) otherwise


def _mlp_kernel(x_ref, wh_ref, bh_ref, wo_ref, bo_ref, o_ref, *, hidden_layers):
    """One batch tile.  x_ref: (TB, C) f32 — raw input layout, no wrapper transpose."""
    # First sigmoid (out_activation hit during the _modules iteration).
    x = jax.nn.sigmoid(x_ref[...].astype(jnp.float32))              # (TB, C) f32

    if hidden_layers == 0:
        # Degenerate stack: only the output head.  Transpose once (XLU).
        h = x.T                                                      # (C, TB)
    else:
        # First hidden layer: fold the (TB,C)->(C,TB) transpose into the MXU
        # contraction by contracting the C axis of BOTH operands.
        y = lax.dot_general(
            wh_ref[0], x.astype(jnp.bfloat16),                       # (C,C) bf16, (TB,C) bf16
            dimension_numbers=(((1,), (1,)), ((), ())),
            preferred_element_type=jnp.float32) + bh_ref[0]          # (C, TB) f32
        h = jnp.maximum(y, _NEG_SLOPE * y)                           # LeakyReLU

        def layer(l, h):
            w = wh_ref[l]                                            # (C, C) bf16, (out, in)
            b = bh_ref[l]                                            # (C, 1) f32
            y = jnp.dot(w, h.astype(jnp.bfloat16),
                        preferred_element_type=jnp.float32) + b      # (C, TB) f32 acc
            return jnp.maximum(y, _NEG_SLOPE * y)                    # LeakyReLU (single max)

        if hidden_layers <= _UNROLL_MAX_LAYERS:
            for l in range(1, hidden_layers):                        # static unroll
                h = layer(l, h)
        else:
            h = lax.fori_loop(1, hidden_layers, layer, h, unroll=2)  # scheduler-visible body

    # Output head Linear(C, 1): broadcast-multiply (VPU) + sublane reduce (XLU);
    # result is a lane-dense (1, TB) slab -> unmasked stores.
    logits = jnp.sum(h * wo_ref[...], axis=0, keepdims=True) + bo_ref[...]
    o_ref[...] = jax.nn.sigmoid(logits)                              # (1, TB) f32


def _round_up(x, m):
    return (x + m - 1) // m * m


def nonlinear_nn_forward(x, wh, bh, wo, bo, *, tb=8192):
    """Forward pass of nonlinearNN.

    x : (B, C) f32      inputs
    wh: (H, C, C) f32   hidden Linear weights, PyTorch (out, in) layout
    bh: (H, C)  f32     hidden Linear biases
    wo: (1, C)  f32     output Linear weight (PyTorch layout)
    bo: (1,)    f32     output Linear bias
    returns (B,) f32
    """
    B, C = x.shape
    H = int(wh.shape[0])

    # --- Batch-tile selection ---------------------------------------------
    # Lane tile: always a multiple of 256 (MXU / lane width on all generations).
    tb = _round_up(max(256, min(int(tb), 16384)), 256)
    B256 = _round_up(B, 256)
    tb = min(tb, B256)
    # Keep >= 2 grid steps when the batch allows it so the "parallel" axis can
    # be sharded across both v7x TensorCores (harmless on v5e/v6e).
    if B256 // tb < 2 and B256 >= 512:
        tb = max(256, (B256 // 2) // 256 * 256)
    Bp = _round_up(B, tb)

    # Wrapper-side plumbing: pad the batch only (no transpose, no extra HBM pass
    # beyond the pad copy when Bp != B).
    x_k = x.astype(jnp.float32)
    if Bp != B:
        x_k = jnp.pad(x_k, ((0, Bp - B), (0, 0)))

    # H == 0 degenerate case: feed dummy (unused) hidden params so BlockSpecs stay valid.
    H_eff = max(H, 1)
    if H == 0:
        wh = jnp.zeros((1, C, C), jnp.float32)
        bh = jnp.zeros((1, C), jnp.float32)

    wh_k = wh.astype(jnp.bfloat16)                      # bf16 MXU operands (f32 accumulation)
    bh_k = bh.reshape(H_eff, C, 1).astype(jnp.float32)
    wo_k = wo.reshape(C, 1).astype(jnp.float32)
    bo_k = bo.reshape(1, 1).astype(jnp.float32)

    kernel = functools.partial(_mlp_kernel, hidden_layers=H)
    grid = (Bp // tb,)

    # VMEM budget from actual buffers (double-buffered tiles + resident weights
    # + activation headroom), well under every generation's physical VMEM.
    vmem_est = (
        2 * tb * C * 4                                  # x tile, double-buffered (f32)
        + 2 * tb * 4                                    # output tile, double-buffered
        + 2 * (H_eff * C * C * 2 + H_eff * C * 4 + C * 4 + 4)   # weights/biases
        + 6 * tb * C * 4                                # intermediate (C, TB) activations
    )
    vmem_limit = int(min(32 * 1024 * 1024, max(8 * 1024 * 1024, 2 * vmem_est)))

    out = pl.pallas_call(
        kernel,
        out_shape=jax.ShapeDtypeStruct((1, Bp), jnp.float32),
        grid_spec=pltpu.PrefetchScalarGridSpec(
            num_scalar_prefetch=0,
            grid=grid,
            in_specs=[
                pl.BlockSpec((tb, C), lambda i: (i, 0)),            # x tile (pipelined)
                pl.BlockSpec((H_eff, C, C), lambda i: (0, 0, 0)),   # resident hidden weights
                pl.BlockSpec((H_eff, C, 1), lambda i: (0, 0, 0)),   # resident hidden biases
                pl.BlockSpec((C, 1), lambda i: (0, 0)),             # head weight (column)
                pl.BlockSpec((1, 1), lambda i: (0, 0)),             # head bias
            ],
            out_specs=pl.BlockSpec((1, tb), lambda i: (0, i)),      # lane-dense output slab
        ),
        compiler_params=pltpu.CompilerParams(
            dimension_semantics=("parallel",),                      # megacore sharding on v7x
            vmem_limit_bytes=vmem_limit,
        ),
    )(x_k, wh_k, bh_k, wo_k, bo_k)

    return out.reshape(-1)[:B]                                      # drop batch padding; .view(-1)


def _reference(x, wh, bh, wo, bo):
    h = jax.nn.sigmoid(x)
    for l in range(wh.shape[0]):
        h = h @ wh[l].T + bh[l]
        h = jnp.where(h > 0, h, _NEG_SLOPE * h)
    out = h @ wo.T + bo
    return jax.nn.sigmoid(out).reshape(-1)


def _make_params(key, hidden_layers, no_criteria):
    kwh, kbh, kwo, kbo = jax.random.split(key, 4)
    scale = 1.0 / jnp.sqrt(jnp.float32(no_criteria))
    h_eff = max(hidden_layers, 1)
    wh = scale * jax.random.normal(
        kwh, (h_eff, no_criteria, no_criteria), dtype=jnp.float32)[:hidden_layers]
    bh = scale * jax.random.normal(
        kbh, (h_eff, no_criteria), dtype=jnp.float32)[:hidden_layers]
    wo = scale * jax.random.normal(kwo, (1, no_criteria), dtype=jnp.float32)
    bo = scale * jax.random.normal(kbo, (1,), dtype=jnp.float32)
    return wh, bh, wo, bo


if __name__ == "__main__":
    key = jax.random.PRNGKey(0)

    # Test 1: H=3 (static-unrolled stack), default tb; B=600 -> tb clamps to 256,
    # 3 grid steps with batch padding (exercises the multi-tile + pad path).
    k1, k2, key = jax.random.split(key, 3)
    H, C, B = 3, 32, 600
    wh, bh, wo, bo = _make_params(k1, H, C)
    x = jax.random.normal(k2, (B, C), dtype=jnp.float32)
    y = nonlinear_nn_forward(x, wh, bh, wo, bo)
    jax.block_until_ready(y)
    y_ref = _reference(x, wh, bh, wo, bo)
    assert y.shape == (B,), y.shape
    # bf16 matmul operands (f32 accumulation) -> loosened tolerance vs f32 reference.
    assert jnp.allclose(y, y_ref, atol=2e-2, rtol=2e-2), float(jnp.max(jnp.abs(y - y_ref)))

    # Test 2: deeper stack exercising the lax.fori_loop(unroll=2) layer path (single tile).
    k3, k4, _ = jax.random.split(key, 3)
    H2, C2, B2 = 10, 32, 40
    wh2, bh2, wo2, bo2 = _make_params(k3, H2, C2)
    x2 = jax.random.normal(k4, (B2, C2), dtype=jnp.float32)
    y2 = nonlinear_nn_forward(x2, wh2, bh2, wo2, bo2)
    jax.block_until_ready(y2)
    y2_ref = _reference(x2, wh2, bh2, wo2, bo2)
    assert y2.shape == (B2,), y2.shape
    assert jnp.allclose(y2, y2_ref, atol=2e-2, rtol=2e-2), float(jnp.max(jnp.abs(y2 - y2_ref)))

    print("KERNEL_OK")
</pallas_src>

<mosaic_0001>
module attributes {stable_mosaic.version = 11 : i64} {
  func.func @_mlp_kernel(%arg0: i32, %arg1: memref<256x32xf32, #tpu.memory_space<vmem>>, %arg2: memref<3x32x32xbf16, #tpu.memory_space<vmem>>, %arg3: memref<3x32x1xf32, #tpu.memory_space<vmem>>, %arg4: memref<32x1xf32, #tpu.memory_space<vmem>>, %arg5: memref<1x1xf32, #tpu.memory_space<vmem>>, %arg6: memref<1x256xf32, #tpu.memory_space<vmem>>) attributes {dimension_semantics = [#tpu.dimension_semantics<parallel>], iteration_bounds = array<i64: 3>, scalar_prefetch = 0 : i64, scratch_operands = 0 : i64, tpu.core_type = #tpu.core_type<tc>, window_params = [{transform_indices = @transform_0, window_bounds = array<i64: 256, 32>}, {pipeline_mode = #tpu.pipeline_mode<synchronous>, transform_indices = @transform_1, window_bounds = array<i64: 3, 32, 32>}, {pipeline_mode = #tpu.pipeline_mode<synchronous>, transform_indices = @transform_2, window_bounds = array<i64: 3, 32, 1>}, {pipeline_mode = #tpu.pipeline_mode<synchronous>, transform_indices = @transform_3, window_bounds = array<i64: 32, 1>}, {pipeline_mode = #tpu.pipeline_mode<synchronous>, transform_indices = @transform_4, window_bounds = array<i64: 1, 1>}, {transform_indices = @transform_5, window_bounds = array<i64: 1, 256>}]} {
    %c0 = arith.constant 0 : index
    %c0_0 = arith.constant 0 : index
    %0 = vector.load %arg1[%c0, %c0_0] : memref<256x32xf32, #tpu.memory_space<vmem>>, vector<256x32xf32>
    %1 = arith.negf %0 : vector<256x32xf32>
    %2 = math.exp %1 : vector<256x32xf32>
    %cst = arith.constant 1.000000e+00 : f32
    %3 = vector.broadcast %cst : f32 to vector<256x32xf32>
    %4 = arith.addf %3, %2 : vector<256x32xf32>
    %5 = arith.divf %3, %4 : vector<256x32xf32>
    %c0_1 = arith.constant 0 : index
    %c0_2 = arith.constant 0 : index
    %c0_3 = arith.constant 0 : index
    %6 = vector.load %arg2[%c0_1, %c0_2, %c0_3] : memref<3x32x32xbf16, #tpu.memory_space<vmem>>, vector<1x32x32xbf16>
    %7 = vector.shape_cast %6 : vector<1x32x32xbf16> to vector<32x32xbf16>
    %8 = arith.truncf %5 : vector<256x32xf32> to vector<256x32xbf16>
    %cst_4 = arith.constant dense<0.000000e+00> : vector<32x256xf32>
    %9 = tpu.matmul %7, %8, %cst_4 {dimension_numbers = #tpu.dot_dimension_numbers<[1], [1], [0], [0], [0, 0, 1, 0], [], []>} : vector<32x32xbf16>, vector<256x32xbf16>, vector<32x256xf32> -> vector<32x256xf32>
    %c0_5 = arith.constant 0 : index
    %c0_6 = arith.constant 0 : index
    %c0_7 = arith.constant 0 : index
    %10 = vector.load %arg3[%c0_5, %c0_6, %c0_7] : memref<3x32x1xf32, #tpu.memory_space<vmem>>, vector<1x32x1xf32>
    %11 = vector.shape_cast %10 : vector<1x32x1xf32> to vector<32x1xf32>
    %12 = vector.broadcast %11 : vector<32x1xf32> to vector<32x256xf32>
    %13 = arith.addf %9, %12 : vector<32x256xf32>
    %cst_8 = arith.constant 0.00999999977 : f32
    %14 = vector.broadcast %cst_8 : f32 to vector<32x256xf32>
    %15 = arith.mulf %14, %13 : vector<32x256xf32>
    %16 = arith.maximumf %13, %15 : vector<32x256xf32>
    %c1 = arith.constant 1 : index
    %c0_9 = arith.constant 0 : index
    %c0_10 = arith.constant 0 : index
    %17 = vector.load %arg2[%c1, %c0_9, %c0_10] : memref<3x32x32xbf16, #tpu.memory_space<vmem>>, vector<1x32x32xbf16>
    %18 = vector.shape_cast %17 : vector<1x32x32xbf16> to vector<32x32xbf16>
    %c1_11 = arith.constant 1 : index
    %c0_12 = arith.constant 0 : index
    %c0_13 = arith.constant 0 : index
    %19 = vector.load %arg3[%c1_11, %c0_12, %c0_13] : memref<3x32x1xf32, #tpu.memory_space<vmem>>, vector<1x32x1xf32>
    %20 = vector.shape_cast %19 : vector<1x32x1xf32> to vector<32x1xf32>
    %21 = arith.truncf %16 : vector<32x256xf32> to vector<32x256xbf16>
    %cst_14 = arith.constant dense<0.000000e+00> : vector<32x256xf32>
    %22 = tpu.matmul %18, %21, %cst_14 {dimension_numbers = #tpu.dot_dimension_numbers<[1], [0], [0], [1], [0, 0, 1, 1], [], []>} : vector<32x32xbf16>, vector<32x256xbf16>, vector<32x256xf32> -> vector<32x256xf32>
    %23 = vector.broadcast %20 : vector<32x1xf32> to vector<32x256xf32>
    %24 = arith.addf %22, %23 : vector<32x256xf32>
    %cst_15 = arith.constant 0.00999999977 : f32
    %25 = vector.broadcast %cst_15 : f32 to vector<32x256xf32>
    %26 = arith.mulf %25, %24 : vector<32x256xf32>
    %27 = arith.maximumf %24, %26 : vector<32x256xf32>
    %c2 = arith.constant 2 : index
    %c0_16 = arith.constant 0 : index
    %c0_17 = arith.constant 0 : index
    %28 = vector.load %arg2[%c2, %c0_16, %c0_17] : memref<3x32x32xbf16, #tpu.memory_space<vmem>>, vector<1x32x32xbf16>
    %29 = vector.shape_cast %28 : vector<1x32x32xbf16> to vector<32x32xbf16>
    %c2_18 = arith.constant 2 : index
    %c0_19 = arith.constant 0 : index
    %c0_20 = arith.constant 0 : index
    %30 = vector.load %arg3[%c2_18, %c0_19, %c0_20] : memref<3x32x1xf32, #tpu.memory_space<vmem>>, vector<1x32x1xf32>
    %31 = vector.shape_cast %30 : vector<1x32x1xf32> to vector<32x1xf32>
    %32 = arith.truncf %27 : vector<32x256xf32> to vector<32x256xbf16>
    %cst_21 = arith.constant dense<0.000000e+00> : vector<32x256xf32>
    %33 = tpu.matmul %29, %32, %cst_21 {dimension_numbers = #tpu.dot_dimension_numbers<[1], [0], [0], [1], [0, 0, 1, 1], [], []>} : vector<32x32xbf16>, vector<32x256xbf16>, vector<32x256xf32> -> vector<32x256xf32>
    %34 = vector.broadcast %31 : vector<32x1xf32> to vector<32x256xf32>
    %35 = arith.addf %33, %34 : vector<32x256xf32>
    %cst_22 = arith.constant 0.00999999977 : f32
    %36 = vector.broadcast %cst_22 : f32 to vector<32x256xf32>
    %37 = arith.mulf %36, %35 : vector<32x256xf32>
    %38 = arith.maximumf %35, %37 : vector<32x256xf32>
    %c0_23 = arith.constant 0 : index
    %c0_24 = arith.constant 0 : index
    %39 = vector.load %arg4[%c0_23, %c0_24] : memref<32x1xf32, #tpu.memory_space<vmem>>, vector<32x1xf32>
    %40 = vector.broadcast %39 : vector<32x1xf32> to vector<32x256xf32>
    %41 = arith.mulf %38, %40 : vector<32x256xf32>
    %cst_25 = arith.constant dense<0.000000e+00> : vector<256xf32>
    %42 = vector.multi_reduction <add>, %41, %cst_25 [0] : vector<32x256xf32> to vector<256xf32>
    %43 = vector.shape_cast %42 : vector<256xf32> to vector<1x256xf32>
    %c0_26 = arith.constant 0 : index
    %c0_27 = arith.constant 0 : index
    %44 = vector.load %arg5[%c0_26, %c0_27] : memref<1x1xf32, #tpu.memory_space<vmem>>, vector<1x1xf32>
    %45 = vector.broadcast %44 : vector<1x1xf32> to vector<1x256xf32>
    %46 = arith.addf %43, %45 : vector<1x256xf32>
    %47 = arith.negf %46 : vector<1x256xf32>
    %48 = math.exp %47 : vector<1x256xf32>
    %cst_28 = arith.constant 1.000000e+00 : f32
    %49 = vector.broadcast %cst_28 : f32 to vector<1x256xf32>
    %50 = arith.addf %49, %48 : vector<1x256xf32>
    %51 = arith.divf %49, %50 : vector<1x256xf32>
    %c0_29 = arith.constant 0 : index
    %c0_30 = arith.constant 0 : index
    %52 = vector.load %arg6[%c0_29, %c0_30] : memref<1x256xf32, #tpu.memory_space<vmem>>, vector<1x256xf32>
    tpu.vector_store %arg6[%c0_29, %c0_30], %51 {strides = array<i32>} : memref<1x256xf32, #tpu.memory_space<vmem>>, vector<1x256xf32>,
    return
  }
  func.func @transform_0(%arg0: i32) -> (i32, i32) {
    %c0_i32 = arith.constant 0 : i32
    %c0_i32_0 = arith.constant 0 : i32
    return %arg0, %c0_i32 : i32, i32
  }
  func.func @transform_1(%arg0: i32) -> (i32, i32, i32) {
    %c0_i32 = arith.constant 0 : i32
    %c0_i32_0 = arith.constant 0 : i32
    %c0_i32_1 = arith.constant 0 : i32
    %c0_i32_2 = arith.constant 0 : i32
    return %c0_i32, %c0_i32_0, %c0_i32_1 : i32, i32, i32
  }
  func.func @transform_2(%arg0: i32) -> (i32, i32, i32) {
    %c0_i32 = arith.constant 0 : i32
    %c0_i32_0 = arith.constant 0 : i32
    %c0_i32_1 = arith.constant 0 : i32
    %c0_i32_2 = arith.constant 0 : i32
    return %c0_i32, %c0_i32_0, %c0_i32_1 : i32, i32, i32
  }
  func.func @transform_3(%arg0: i32) -> (i32, i32) {
    %c0_i32 = arith.constant 0 : i32
    %c0_i32_0 = arith.constant 0 : i32
    %c0_i32_1 = arith.constant 0 : i32
    return %c0_i32, %c0_i32_0 : i32, i32
  }
  func.func @transform_4(%arg0: i32) -> (i32, i32) {
    %c0_i32 = arith.constant 0 : i32
    %c0_i32_0 = arith.constant 0 : i32
    %c0_i32_1 = arith.constant 0 : i32
    return %c0_i32, %c0_i32_0 : i32, i32
  }
  func.func @transform_5(%arg0: i32) -> (i32, i32) {
    %c0_i32 = arith.constant 0 : i32
    %c0_i32_0 = arith.constant 0 : i32
    return %c0_i32, %arg0 : i32, i32
  }
}

</mosaic_0001>

<bundles_post_ra>
// kernel: tpu_custom_call.1
= control target key start
LH: loop header
LB: loop body
LE: loop exit
PB: predicated region body
PF: predicated region fallthrough
CT: control target
= control target key end

     0   :  { %s1661_s0 = inlined_call_operand.vmem [shape: f32[768,32], index: 0, kind: input, shape index: {}]   ;;  %s1662_s1 = inlined_call_operand.vmem [shape: bf16[3,32,32], index: 1, kind: input, shape index: {}]   ;;  %s1663_s2 = inlined_call_operand.vmem [shape: f32[3,32,1], index: 2, kind: input, shape index: {}]   ;;  %s1664_s3 = inlined_call_operand.vmem [shape: f32[32,1], index: 3, kind: input, shape index: {}]   ;;  %s1665_s4 = inlined_call_operand.<no memory space> [shape: f32[1,1], index: 4, kind: input, shape index: {}]   ;;  %s1666_s5 = inlined_call_operand.hbm [shape: f32[1,768], index: 5, kind: output, shape index: {}]  }
   0x1   :  { %v10_v0 = vstv %s1665_s4 }
   0x2   :  { %11 = vst [vmem:[#allocation2] sm:$0x1] %v10_v0 }
   0x3   :  { %12 = vsyncpa [#allocation4], 0 }
   0x4   :  { %14 = vsyncpa [#allocation4 + $0x1], 0  ;;  %s1428_s20 = smov 0   ;;  %s1430_s21 = smov 0  }
   0x5   :  { %s1432_s22 = smov 0   ;;  %s1434_s23 = smov 0  }
   0x6 LB: > { %s1039_s4 = sadd.s32 4294967295, %s1390_s23   ;;  %s1040_s24 = sadd.s32 4294967294, %s1390_s23   ;;  %s1390_s23 = sphi %s1434_s23, %s1672_s23   ;;  %s1386_s22 = sphi %s1432_s22, %s1671_s22   ;;  %s1382_s21 = sphi %s1430_s21, %s1670_s21   ;;  %s1378_s20 = sphi %s1428_s20, %s1669_s20  }
   0x7   : > { %s1451_s25 = sadd.s32 1, %s1390_s23   ;;  %s137_s26 = sadd.s32 1, %s1386_s22 }
   0x8   : > { %s134_s27 = ssub.s32 %s1390_s23, %s1451_s25  ;;  %p147_p0 = scmp.ne.s32.totalorder %s1386_s22, %s1382_s21 }
   0x9   : > { %p135_p1 = scmp.eq.s32.totalorder %s134_s27, 0  ;;  %p148_p2 = scmp.eq.s32.totalorder %s1039_s4, 2 }
   0xa   : > { %p153_p3 = scmp.ne.s32.totalorder %s1382_s21, %s1378_s20  ;;  %p154_p4 = scmp.eq.s32.totalorder %s1040_s24, 2 }
   0xb   : > { %s1461_s28 = scalar_select %p135_p1, %s1386_s22, %s137_s26  }
   0xc   : > { %p1463_p5 = por %p148_p2, %p147_p0  ;;  %p1467_p6 = por %p154_p4, %p153_p3 }
   0xd   : > { %p1043_p7 = scmp.ge.s32.totalorder %s1390_s23, 1  ;;  %p193_p8 = scmp.lt.s32.totalorder %s1390_s23, 4 }
   0xf   : > { %p194_p9 = pnand %p1043_p7, %p193_p8 }
  0x10   : > { %s1473_s6 = sshll.u32 (!%p194_p9), %s1039_s4, 5  ;;  %v1479_v1 = vld [vmem:[%s1662_s1] sm:$0xff] (!%p194_p9)   ;;  %vm507_vm0 = vcmask (!%p194_p9), 261120   ;;  %v1392_v3 = vmov (!%p194_p9), 0   ;;  %v475_v4 = vld [vmem:[%s1663_s2 + $0x10] sm:$0xff] (!%p194_p9)  ;;  %v474_v5 = vld [vmem:[%s1663_s2 + $0x8] sm:$0xff] (!%p194_p9) }
  0x11   : > { %197 = sbr.rel (%p194_p9) target bundleno = 889 (0x379), region = 40  ;;  %p222_p10 = scmp.lt.s32.totalorder (!%p194_p9), %s1473_s6, 95  ;;  %v473_v2 = vld [vmem:[%s1663_s2] sm:$0xff] (!%p194_p9)  ;;  %1131 = vmatprep.mubr.msk.bf16.mxu0 (!%p194_p9), %vm507_vm0, %v1479_v1  ;;  %1184 = vset.pattern.permute.xlu0 (!%p194_p9), %v1392_v3  ;;  %v476_v6 = vld [vmem:[%s1663_s2 + $0x18] sm:$0xff] (!%p194_p9)  ;;  %v1088_v21 = vld [vmem:[%s1663_s2 + $0x28] sm:$0xff] (!%p194_p9) }
  0x12   : > { %479 = vperm.xlu0 (!%p194_p9), %1184, %v473_v2   ;;  %1185 = vset.pattern.permute.xlu1 (!%p194_p9), %v1392_v3  ;;  %v1087_v10 = vld [vmem:[%s1663_s2 + $0x20] sm:$0xff] (!%p194_p9)  ;;  %v1089_v28 = vld [vmem:[%s1663_s2 + $0x30] sm:$0xff] (!%p194_p9)  ;;  %v1090_v31 = vld [vmem:[%s1663_s2 + $0x38] sm:$0xff] (!%p194_p9)  ;;  %s218_s27 = sand.u32 (!%p194_p9), 1, %s1382_s21   ;;  %s1619_s12 = scalar_lea.hbm (!%p194_p9), %s1666_s5, %s1473_s6 }
  0x13   : > { %489 = vperm.xlu1 (!%p194_p9), %1185, %v475_v4   ;;  %713 = vmatprep.mubr.bf16.mxu1 (!%p194_p9), %v1392_v3  ;;  %v1099_v36 = vld [vmem:[%s1663_s2 + $0x40] sm:$0xff] (!%p194_p9)  ;;  %v1100_v38 = vld [vmem:[%s1663_s2 + $0x48] sm:$0xff] (!%p194_p9)  ;;  %v1101_v42 = vld [vmem:[%s1663_s2 + $0x50] sm:$0xff] (!%p194_p9)  ;;  %s1044_s7 = sshll.u32 (!%p194_p9), %s218_s27, 1 }
  0x14   : > { %v1102_v45 = vld [vmem:[%s1663_s2 + $0x58] sm:$0xff] (!%p194_p9)  ;;  %v869_v52 = vld [vmem:[%s1664_s3] sm:$0xff] (!%p194_p9)  ;;  %v870_v55 = vld [vmem:[%s1664_s3 + $0x8] sm:$0xff] (!%p194_p9)  ;;  %s220_s8 = scalar_lea.vmem (!%p194_p9), [#allocation3], %s1044_s7 }
  0x15   : > { %v871_v63 = vld [vmem:[%s1664_s3 + $0x10] sm:$0xff] (!%p194_p9)  ;;  %s981_s9 = sshll.u32 (!%p194_p9), %s220_s8, 4  ;;  %s1621_s9 = int_to_ptr.vmem [resolvable:$true] %s981_s9 }
  0x16   : > { %484 = vperm.xlu0 (!%p194_p9), %1184, %v474_v5   ;;  %v872_v5 = vld [vmem:[%s1664_s3 + $0x18] sm:$0xff] (!%p194_p9)  ;;  %s1328_s13 = scalar_lea.vmem (!%p194_p9), %s1621_s9, 32 }
  0x17   : > { %494 = vperm.xlu1 (!%p194_p9), %1185, %v476_v6   ;;  %p1329_p11 = scmp.ne.s32.totalorder (!%p194_p9), %s1621_s9, %s1328_s13 }
  0x18   : > { %s223_s11 = scalar_select %p222_p10, %s1473_s6, 95 }
  0x19   : > { %p1330_p12 = pnand %p1329_p11, %p1463_p5 }
  0x1a   : > { %s1046_s14 = sshll.u32 %s223_s11, 3  ;;  %647 = vperm.xlu0 %1184, %v1087_v10  }
  0x1b   : > { %s1499_s19 = scalar_lea.vmem %s1661_s0, %s1046_s14  ;;  %652 = vperm.xlu1 %1185, %v1088_v21   ;;  %p1331_p13 = pneg %p1330_p12 }
  0x1c   : > { %v245_v7 = vld [vmem:[%s1499_s19 + $0x80] sm:$0xff]  ;;  %v246_v8 = vld [vmem:[%s1499_s19 + $0x88] sm:$0xff]  ;;  %v247_v14 = vld [vmem:[%s1499_s19 + $0x90] sm:$0xff]  ;;  %s1394_s14 = smov [#allocation3]  }
  0x1d   : > { %v229_v9 = vld [vmem:[%s1499_s19] sm:$0xff]  ;;  %v1063_v11 = vmul.f32 -1.442695, %v245_v7  ;;  %v1064_v12 = vmul.f32 -1.442695, %v246_v8  ;;  %v230_v13 = vld [vmem:[%s1499_s19 + $0x8] sm:$0xff] }
  0x1e   : > { %v1047_v15 = vmul.f32 -1.442695, %v229_v9  ;;  %v1048_v16 = vmul.f32 -1.442695, %v230_v13  ;;  %v248_v17 = vld [vmem:[%s1499_s19 + $0x98] sm:$0xff]  ;;  %v231_v18 = vld [vmem:[%s1499_s19 + $0x10] sm:$0xff]  ;;  %657 = vperm.xlu0 %1184, %v1089_v28  }
  0x1f   : > { %1192 = vpow2.f32 %v1063_v11  ;;  %v1065_v19 = vmul.f32 -1.442695, %v247_v14  ;;  %v232_v20 = vld [vmem:[%s1499_s19 + $0x18] sm:$0xff]  ;;  %v1066_v22 = vmul.f32 -1.442695, %v248_v17  ;;  %v249_v23 = vld [vmem:[%s1499_s19 + $0xa0] sm:$0xff]  ;;  %662 = vperm.xlu1 %1185, %v1090_v31  }
  0x20   : > { %1194 = vpow2.f32 %v1064_v12  ;;  %v1049_v24 = vmul.f32 -1.442695, %v231_v18  ;;  %v250_v25 = vld [vmem:[%s1499_s19 + $0xa8] sm:$0xff]  ;;  %v1050_v26 = vmul.f32 -1.442695, %v232_v20  ;;  %v233_v27 = vld [vmem:[%s1499_s19 + $0x20] sm:$0xff] }
  0x21   : > { %1196 = vpow2.f32 %v1047_v15  ;;  %v1067_v29 = vmul.f32 -1.442695, %v249_v23  ;;  %v234_v30 = vld [vmem:[%s1499_s19 + $0x28] sm:$0xff]  ;;  %v1068_v32 = vmul.f32 -1.442695, %v250_v25  ;;  %v251_v33 = vld [vmem:[%s1499_s19 + $0xb0] sm:$0xff] }
  0x22   : > { %1198 = vpow2.f32 %v1048_v16  ;;  %v1051_v34 = vmul.f32 -1.442695, %v233_v27  ;;  %v1052_v35 = vmul.f32 -1.442695, %v234_v30  ;;  %v1069_v37 = vmul.f32 -1.442695, %v251_v33  ;;  %766 = vperm.xlu0 %1184, %v1099_v36  }
  0x23   : > { %1200 = vpow2.f32 %v1065_v19  ;;  %771 = vperm.xlu1 %1185, %v1100_v38   ;;  %v252_v60 = vld [vmem:[%s1499_s19 + $0xb8] sm:$0xff]  ;;  %v235_v4 = vld [vmem:[%s1499_s19 + $0x30] sm:$0xff]  ;;  %v253_v12 = vld [vmem:[%s1499_s19 + $0xc0] sm:$0xff]  ;;  %s1332_s15 = sshll.u32 %s1394_s14, 4  ;;  %s1333_s15 = int_to_ptr.vmem [resolvable:$false] %s1332_s15 }
  0x24   : > { %1202 = vpow2.f32 %v1066_v22  ;;  %v1070_v8 = vmul.f32 -1.442695, %v252_v60  ;;  %v236_v9 = vld [vmem:[%s1499_s19 + $0x38] sm:$0xff]  ;;  %v1053_v15 = vmul.f32 -1.442695, %v235_v4  ;;  %v254_v16 = vld [vmem:[%s1499_s19 + $0xc8] sm:$0xff]  ;;  %p1335_p0 = scmp.lt.s32.totalorder %s1621_s9, %s1333_s15 }
  0x25   : > { %1204 = vpow2.f32 %v1049_v24  ;;  %v919_v17 = vld [vmem:[#allocation2] sm:$0x1]  ;;  %v1054_v19 = vmul.f32 -1.442695, %v236_v9  ;;  %v1071_v23 = vmul.f32 -1.442695, %v253_v12 }
  0x26   : > { %1206 = vpow2.f32 %v1050_v26  ;;  %776 = vperm.xlu0 %1184, %v1101_v42   ;;  %v237_v20 = vld [vmem:[%s1499_s19 + $0x40] sm:$0xff]  ;;  %v238_v24 = vld [vmem:[%s1499_s19 + $0x48] sm:$0xff]  ;;  %v1072_v26 = vmul.f32 -1.442695, %v254_v16  ;;  %v255_v27 = vld [vmem:[%s1499_s19 + $0xd0] sm:$0xff]  ;;  %s1334_s16 = scalar_lea.vmem %s1333_s15, 64 }
  0x27   : > { %1208 = vpow2.f32 %v1067_v29  ;;  %781 = vperm.xlu1 %1185, %v1102_v45   ;;  %v1055_v30 = vmul.f32 -1.442695, %v237_v20  ;;  %v256_v31 = vld [vmem:[%s1499_s19 + $0xd8] sm:$0xff]  ;;  %v1056_v33 = vmul.f32 -1.442695, %v238_v24  ;;  %v257_v42 = vld [vmem:[%s1499_s19 + $0xe0] sm:$0xff]  ;;  %p1336_p1 = scmp.lt.s32.totalorder %s1334_s16, %s1328_s13 }
  0x28   : > { %1210 = vpow2.f32 %v1068_v32  ;;  %v1073_v38 = vmul.f32 -1.442695, %v255_v27 }
  0x29   : > { %v1193_v39 = vpop.eup %1192  ;;  %1212 = vpow2.f32 %v1051_v34  ;;  %v239_v34 = vld [vmem:[%s1499_s19 + $0x50] sm:$0xff]  ;;  %p1337_p2 = por %p1336_p1, %p1335_p0 }
  0x2a   : > { %v1195_v40 = vpop.eup %1194  ;;  %v373_v41 = vadd.f32 1.0, %v1193_v39  ;;  %1214 = vpow2.f32 %v1052_v35  ;;  %875 = vperm.xlu0 %1184, %v869_v52   ;;  %v240_v39 = vld [vmem:[%s1499_s19 + $0x58] sm:$0xff]  ;;  %v1057_v45 = vmul.f32 -1.442695, %v239_v34 }
  0x2b   : > { %v1197_v43 = vpop.eup %1196  ;;  %v374_v44 = vadd.f32 1.0, %v1195_v40  ;;  %1216 = vpow2.f32 %v1069_v37  ;;  %880 = vperm.xlu1 %1185, %v870_v55   ;;  %p1338_p3 = pnand %p1337_p2, %p1331_p13 }
  0x2c   : > { %v1199_v46 = vpop.eup %1198  ;;  %1218 = vrcp.f32 %v373_v41  ;;  %v357_v47 = vadd.f32 1.0, %v1197_v43  ;;  %v1074_v41 = vmul.f32 -1.442695, %v256_v31 }
  0x2d   : > { %v1201_v48 = vpop.eup %1200  ;;  %1220 = vrcp.f32 %v374_v44  ;;  %v358_v49 = vadd.f32 1.0, %v1199_v46 }
  0x2e   : > { %v1203_v50 = vpop.eup %1202  ;;  %1222 = vrcp.f32 %v357_v47  ;;  %v375_v51 = vadd.f32 1.0, %v1201_v48  ;;  %885 = vperm.xlu0 %1184, %v871_v63   ;;  %v1058_v47 = vmul.f32 -1.442695, %v240_v39  ;;  %v258_v48 = vld [vmem:[%s1499_s19 + $0xe8] sm:$0xff] }
  0x2f   : > { %v1205_v53 = vpop.eup %1204  ;;  %1224 = vrcp.f32 %v358_v49  ;;  %v376_v54 = vadd.f32 1.0, %v1203_v50  ;;  %890 = vperm.xlu1 %1185, %v872_v5   ;;  %v1075_v50 = vmul.f32 -1.442695, %v257_v42  ;;  %v1076_v55 = vmul.f32 -1.442695, %v258_v48 }
  0x30   : > { %v1207_v56 = vpop.eup %1206  ;;  %1226 = vrcp.f32 %v375_v51  ;;  %v359_v57 = vadd.f32 1.0, %v1205_v53 }
  0x31   : > { %v1209_v58 = vpop.eup %1208  ;;  %1228 = vrcp.f32 %v376_v54  ;;  %v360_v59 = vadd.f32 1.0, %v1207_v56 }
  0x32   : > { %v1211_v61 = vpop.eup %1210  ;;  %1230 = vrcp.f32 %v359_v57  ;;  %v377_v62 = vadd.f32 1.0, %v1209_v58  ;;  %922 = vperm.xlu0 %1184, %v919_v17  }
  0x33   : > { %v1213_v0 = vpop.eup %1212  ;;  %1232 = vrcp.f32 %v360_v59  ;;  %v378_v2 = vadd.f32 1.0, %v1211_v61 }
  0x34   : > { %v1215_v6 = vpop.eup %1214  ;;  %1234 = vrcp.f32 %v377_v62  ;;  %v361_v7 = vadd.f32 1.0, %v1213_v0 }
  0x35   : > { %v1217_v10 = vpop.eup %1216  ;;  %1236 = vrcp.f32 %v378_v2  ;;  %v362_v11 = vadd.f32 1.0, %v1215_v6 }
  0x36   : > { %v1219_v13 = vpop.eup %1218  ;;  %1238 = vrcp.f32 %v361_v7  ;;  %v379_v14 = vadd.f32 1.0, %v1217_v10 }
  0x37   : > { %v1221_v18 = vpop.eup %1220  ;;  %1240 = vrcp.f32 %v362_v11 }
  0x38   : > { %v1223_v21 = vpop.eup %1222  ;;  %v465_v22 = vpack.c.bf16 %v1221_v18, %v1219_v13  ;;  %1242 = vpow2.f32 %v1070_v8  ;;  %v241_v13 = vld [vmem:[%s1499_s19 + $0x60] sm:$0xff]  ;;  %v242_v18 = vld [vmem:[%s1499_s19 + $0x68] sm:$0xff] }
  0x39   : > { %v1225_v25 = vpop.eup %1224  ;;  %1244 = vrcp.f32 %v379_v14 }
  0x3a   : > { %v1227_v28 = vpop.eup %1226  ;;  %1135 = vmatprep.subr.msk.bf16.mxu0 %vm507_vm0, %v465_v22  ;;  %v457_v29 = vpack.c.bf16 %v1225_v25, %v1223_v21  ;;  %1246 = vpow2.f32 %v1053_v15  ;;  %v1059_v21 = vmul.f32 -1.442695, %v241_v13  ;;  %v259_v22 = vld [vmem:[%s1499_s19 + $0xf0] sm:$0xff]  ;;  %v260_v25 = vld [vmem:[%s1499_s19 + $0xf8] sm:$0xff] }
  0x3b   : > { %v1229_v32 = vpop.eup %1228  ;;  %1248 = vpow2.f32 %v1054_v19 }
  0x3c   : > { %v1231_v35 = vpop.eup %1230  ;;  %v515_v36 = vsel %vm507_vm0, %v457_v29, 0  ;;  %v466_v37 = vpack.c.bf16 %v1229_v32, %v1227_v28  ;;  %1250 = vpow2.f32 %v1071_v23  ;;  %v1060_v28 = vmul.f32 -1.442695, %v242_v18  ;;  %v243_v29 = vld [vmem:[%s1499_s19 + $0x70] sm:$0xff]  ;;  %v1187_v18 = vld [vmem:[%s1662_s1 + $0x8] sm:$0xff]  }
  0x3d   : > { %v1233_v40 = vpop.eup %1232  ;;  %1116 = vmatpush3.bf16.xpose.msra.mxu0 %v515_v36  ;;  %1252 = vpow2.f32 %v1072_v26  ;;  %v1077_v32 = vmul.f32 -1.442695, %v259_v22 }
  0x3e   : > { %v1235_v43 = vpop.eup %1234  ;;  %1136 = vmatprep.subr.msk.bf16.mxu0 %vm507_vm0, %v466_v37  ;;  %v458_v44 = vpack.c.bf16 %v1233_v40, %v1231_v35  ;;  %1254 = vpow2.f32 %v1055_v30  ;;  %v1078_v35 = vmul.f32 -1.442695, %v260_v25 }
  0x3f   : > { %v1237_v46 = vpop.eup %1236  ;;  %1256 = vpow2.f32 %v1056_v33  ;;  %v244_v33 = vld [vmem:[%s1499_s19 + $0x78] sm:$0xff]  ;;  %s967_s19 = scalar_lea.sflag [#allocation4], %s218_s27 }
  0x40   : > { %v1239_v49 = vpop.eup %1238  ;;  %1258 = vpow2.f32 %v1073_v38  ;;  %v518_v53 = vsel %vm507_vm0, %v458_v44, 0  ;;  %v467_v54 = vpack.c.bf16 %v1237_v46, %v1235_v43  ;;  %v1061_v38 = vmul.f32 -1.442695, %v243_v29 }
  0x41   : > { %v1241_v51 = vpop.eup %1240  ;;  %1260 = vpow2.f32 %v1074_v41  ;;  %v1062_v40 = vmul.f32 -1.442695, %v244_v33 }
  0x42   : > { %v1243_v52 = vpop.eup %1242  ;;  %1262 = vpow2.f32 %v1057_v45  ;;  %v459_v62 = vpack.c.bf16 %v1241_v51, %v1239_v49 }
  0x43   : > { %v1245_v56 = vpop.eup %1244  ;;  %v380_v57 = vadd.f32 1.0, %v1243_v52  ;;  %1264 = vpow2.f32 %v1058_v47 }
  0x44   : > { %v1247_v58 = vpop.eup %1246  ;;  %1266 = vpow2.f32 %v1075_v50  ;;  %v521_v9 = vsel %vm507_vm0, %v459_v62, 0 }
  0x45   : > { %v1249_v59 = vpop.eup %1248  ;;  %1118 = vmatpush3.bf16.xpose.msra.mxu0 %v518_v53  ;;  %1268 = vrcp.f32 %v380_v57  ;;  %v363_v60 = vadd.f32 1.0, %v1247_v58 }
  0x46   : > { %v1251_v61 = vpop.eup %1250  ;;  %1137 = vmatprep.subr.msk.bf16.mxu0 %vm507_vm0, %v467_v54  ;;  %v364_v63 = vadd.f32 1.0, %v1249_v59  ;;  %1270 = vpow2.f32 %v1076_v55 }
  0x47   : > { %v1253_v0 = vpop.eup %1252  ;;  %1272 = vrcp.f32 %v363_v60  ;;  %v381_v2 = vadd.f32 1.0, %v1251_v61 }
  0x48   : > { %v1255_v4 = vpop.eup %1254  ;;  %1274 = vrcp.f32 %v364_v63  ;;  %v382_v5 = vadd.f32 1.0, %v1253_v0 }
  0x49   : > { %v1257_v6 = vpop.eup %1256  ;;  %1276 = vrcp.f32 %v381_v2  ;;  %v365_v7 = vadd.f32 1.0, %v1255_v4 }
  0x4a   : > { %v1259_v8 = vpop.eup %1258  ;;  %1278 = vrcp.f32 %v382_v5  ;;  %v366_v10 = vadd.f32 1.0, %v1257_v6 }
  0x4b   : > { %v1261_v11 = vpop.eup %1260  ;;  %1280 = vrcp.f32 %v365_v7  ;;  %v383_v12 = vadd.f32 1.0, %v1259_v8 }
  0x4c   : > { %v1263_v14 = vpop.eup %1262  ;;  %1282 = vrcp.f32 %v366_v10  ;;  %v384_v15 = vadd.f32 1.0, %v1261_v11 }
  0x4d   : > { %v1265_v16 = vpop.eup %1264  ;;  %1120 = vmatpush3.bf16.xpose.msra.mxu0 %v521_v9  ;;  %1284 = vrcp.f32 %v383_v12  ;;  %v367_v17 = vadd.f32 1.0, %v1263_v14 }
  0x4e   : > { %v1267_v19 = vpop.eup %1266  ;;  %1286 = vrcp.f32 %v384_v15  ;;  %v368_v20 = vadd.f32 1.0, %v1265_v16 }
  0x4f   : > { %v1269_v23 = vpop.eup %1268  ;;  %1288 = vrcp.f32 %v367_v17  ;;  %v385_v24 = vadd.f32 1.0, %v1267_v19 }
  0x50   : > { %v1271_v26 = vpop.eup %1270  ;;  %v468_v27 = vpack.c.bf16 %v1269_v23, %v1245_v56  ;;  %1290 = vrcp.f32 %v368_v20 }
  0x51   : > { %v1273_v30 = vpop.eup %1272  ;;  %v386_v31 = vadd.f32 1.0, %v1271_v26  ;;  %1292 = vrcp.f32 %v385_v24 }
  0x52   : > { %v1275_v34 = vpop.eup %1274  ;;  %1138 = vmatprep.subr.msk.bf16.mxu0 %vm507_vm0, %v468_v27  ;;  %1294 = vpow2.f32 %v1059_v21 }
  0x53   : > { %v1277_v36 = vpop.eup %1276  ;;  %v460_v37 = vpack.c.bf16 %v1275_v34, %v1273_v30  ;;  %1296 = vrcp.f32 %v386_v31 }
  0x54   : > { %v1279_v39 = vpop.eup %1278  ;;  %1298 = vpow2.f32 %v1060_v28 }
  0x55   : > { %v1281_v41 = vpop.eup %1280  ;;  %v524_v42 = vsel %vm507_vm0, %v460_v37, 0  ;;  %v469_v43 = vpack.c.bf16 %v1279_v39, %v1277_v36  ;;  %1300 = vpow2.f32 %v1077_v32 }
  0x56   : > { %v1283_v44 = vpop.eup %1282  ;;  %1122 = vmatpush3.bf16.xpose.msra.mxu0 %v524_v42  ;;  %1302 = vpow2.f32 %v1078_v35 }
  0x57   : > { %v1285_v45 = vpop.eup %1284  ;;  %1139 = vmatprep.subr.msk.bf16.mxu0 %vm507_vm0, %v469_v43  ;;  %v461_v46 = vpack.c.bf16 %v1283_v44, %v1281_v41  ;;  %1304 = vpow2.f32 %v1061_v38 }
  0x58   : > { %v1287_v47 = vpop.eup %1286  ;;  %1306 = vpow2.f32 %v1062_v40 }
  0x59   : > { %v1289_v48 = vpop.eup %1288  ;;  %v527_v51 = vsel %vm507_vm0, %v461_v46, 0  ;;  %v470_v52 = vpack.c.bf16 %v1287_v47, %v1285_v45 }
  0x5a   : > { %v1291_v49 = vpop.eup %1290 }
  0x5b   : > { %v1293_v50 = vpop.eup %1292  ;;  %v462_v58 = vpack.c.bf16 %v1291_v49, %v1289_v48 }
  0x5c   : > { %v1295_v53 = vpop.eup %1294 }
  0x5d   : > { %v1297_v54 = vpop.eup %1296  ;;  %v369_v55 = vadd.f32 1.0, %v1295_v53  ;;  %v530_v4 = vsel %vm507_vm0, %v462_v58, 0  ;;  %v1188_v58 = vld [vmem:[%s1662_s1 + $0x10] sm:$0xff]  }
  0x5e   : > { %v1299_v56 = vpop.eup %1298  ;;  %1124 = vmatpush3.bf16.xpose.msra.mxu0 %v527_v51  ;;  %v471_v5 = vpack.c.bf16 %v1297_v54, %v1293_v50 }
  0x5f   : > { %v1301_v57 = vpop.eup %1300  ;;  %1140 = vmatprep.subr.msk.bf16.mxu0 %vm507_vm0, %v470_v52  ;;  %v370_v59 = vadd.f32 1.0, %v1299_v56  ;;  %1308 = vrcp.f32 %v369_v55 }
  0x60   : > { %v1303_v60 = vpop.eup %1302  ;;  %v387_v61 = vadd.f32 1.0, %v1301_v57 }
  0x61   : > { %v1305_v62 = vpop.eup %1304  ;;  %1310 = vrcp.f32 %v370_v59  ;;  %v388_v63 = vadd.f32 1.0, %v1303_v60  ;;  %v1189_v59 = vld [vmem:[%s1662_s1 + $0x18] sm:$0xff]  }
  0x62   : > { %v1307_v0 = vpop.eup %1306  ;;  %1312 = vrcp.f32 %v387_v61  ;;  %v371_v2 = vadd.f32 1.0, %v1305_v62 }
  0x63   : > { %1314 = vrcp.f32 %v388_v63  ;;  %v372_v6 = vadd.f32 1.0, %v1307_v0 }
  0x64   : > { %1316 = vrcp.f32 %v371_v2 }
  0x65   : > { %1318 = vrcp.f32 %v372_v6 }
  0x66   : > { %1126 = vmatpush3.bf16.xpose.msra.mxu0 %v530_v4 }
  0x67   : > { %1141 = vmatprep.subr.msk.bf16.mxu0 %vm507_vm0, %v471_v5 }
  0x69   : > { %v1309_v7 = vpop.eup %1308 }
  0x6b   : > { %v1311_v8 = vpop.eup %1310 }
  0x6c   : > { %v1313_v9 = vpop.eup %1312  ;;  %v463_v10 = vpack.c.bf16 %v1311_v8, %v1309_v7 }
  0x6d   : > { %v1315_v11 = vpop.eup %1314 }
  0x6e   : > { %v1317_v12 = vpop.eup %1316  ;;  %v533_v13 = vsel %vm507_vm0, %v463_v10, 0  ;;  %v472_v14 = vpack.c.bf16 %v1315_v11, %v1313_v9 }
  0x6f   : > { %v1319_v15 = vpop.eup %1318  ;;  %1128 = vmatpush3.bf16.xpose.msra.mxu0 %v533_v13 }
  0x70   : > { %1142 = vmatprep.subr.msk.bf16.mxu0 %vm507_vm0, %v472_v14  ;;  %v464_v16 = vpack.c.bf16 %v1319_v15, %v1317_v12 }
  0x72   : > { %v536_v17 = vsel %vm507_vm0, %v464_v16, 0 }
  0x77   : > { %1130 = vmatpush3.bf16.xpose.msra.mxu0 %v536_v17 }
  0x7e   : > { %1132 = vmatmul.mubr.msk.bf16.vlgmr.msra.gmra.mrb[0].mxu0 %vm507_vm0, %v1479_v1 }
  0x7f   : > { %1133 = vmatprep.mubr.msk.bf16.mxu0 %vm507_vm0, %v1187_v18 }
  0x86   : > { %1134 = vmatmul.mubr.msk.bf16.gmra.mrb[4].mxu0 %vm507_vm0, %v1187_v18 }
  0x91   : > { %v480_v19 = vpop.permute.xlu0 %479 }
  0x92   : > { %v490_v29 = vpop.permute.xlu1 %489 }
  0x95   : > { %v485_v23 = vpop.permute.xlu0 %484 }
  0x96   : > { %v495_v41 = vpop.permute.xlu1 %494 }
  0x99   : > { %v648_v60 = vpop.permute.xlu0 %647 }
  0x9a   : > { %v653_v0 = vpop.permute.xlu1 %652 }
  0x9d   : > { %v658_v14 = vpop.permute.xlu0 %657 }
 0x151   : > { %v596_v20 = vpop.f32.mrb[0].mxu0 }
 0x152   : > { %v597_v21 = vadd.f32 %v596_v20, %v480_v19  ;;  %v598_v22 = vpop.f32.mrb[1].mxu0 }
 0x153   : > { %v599_v24 = vadd.f32 %v598_v22, %v480_v19  ;;  %v600_v25 = vpop.f32.mrb[2].mxu0 }
 0x154   : > { %v615_v26 = vmul.f32 0.01, %v597_v21  ;;  %v601_v27 = vadd.f32 %v600_v25, %v485_v23  ;;  %v602_v28 = vpop.f32.mrb[3].mxu0 }
 0x155   : > { %v616_v30 = vmul.f32 0.01, %v599_v24  ;;  %v603_v31 = vadd.f32 %v602_v28, %v485_v23 }
 0x156   : > { %v617_v32 = vmul.f32 0.01, %v601_v27  ;;  %v623_v1 = vmax.f32 %v597_v21, %v615_v26  ;;  %v663_v21 = vpop.permute.xlu1 %662 }
 0x157   : > { %v618_v33 = vmul.f32 0.01, %v603_v31  ;;  %v624_v36 = vmax.f32 %v599_v24, %v616_v30 }
 0x158   : > { %v625_v34 = vmax.f32 %v601_v27, %v617_v32 }
 0x159   : > { %v606_v35 = vpop.f32.mrb[4].mxu0  ;;  %v626_v37 = vmax.f32 %v603_v31, %v618_v33 }
 0x15a   : > { %v607_v38 = vadd.f32 %v606_v35, %v490_v29  ;;  %v608_v39 = vpop.f32.mrb[5].mxu0  ;;  %v641_v40 = vpack.c.bf16 %v625_v34, %v623_v1 }
 0x15b   : > { %v609_v42 = vadd.f32 %v608_v39, %v490_v29  ;;  %v610_v43 = vpop.f32.mrb[6].mxu0  ;;  %v642_v44 = vpack.c.bf16 %v626_v37, %v624_v36  ;;  %v1190_v37 = vld [vmem:[%s1662_s1 + $0x20] sm:$0xff]   ;;  %v767_v39 = vpop.permute.xlu0 %766 }
 0x15c   : > { %v619_v45 = vmul.f32 0.01, %v607_v38  ;;  %v611_v46 = vadd.f32 %v610_v43, %v495_v41  ;;  %v612_v47 = vpop.f32.mrb[7].mxu0 }
 0x15d   : > { %v620_v48 = vmul.f32 0.01, %v609_v42  ;;  %v613_v49 = vadd.f32 %v612_v47, %v495_v41  ;;  %681 = vmatprep.subr.bf16.mxu1 %v642_v44 }
 0x15e   : > { %v621_v50 = vmul.f32 0.01, %v611_v46  ;;  %682 = vmatpush1.bf16.msra.mxu1 %v641_v40  ;;  %v627_v52 = vmax.f32 %v607_v38, %v619_v45  ;;  %v1191_v38 = vld [vmem:[%s1662_s1 + $0x28] sm:$0xff]   ;;  %v772_v40 = vpop.permute.xlu1 %771 }
 0x15f   : > { %v622_v51 = vmul.f32 0.01, %v613_v49  ;;  %v628_v54 = vmax.f32 %v609_v42, %v620_v48  ;;  %v777_v42 = vpop.permute.xlu0 %776 }
 0x160   : > { %v629_v53 = vmax.f32 %v611_v46, %v621_v50 }
 0x161   : > { %v630_v55 = vmax.f32 %v613_v49, %v622_v51 }
 0x162   : > { %v643_v56 = vpack.c.bf16 %v629_v53, %v627_v52  ;;  %v782_v45 = vpop.permute.xlu1 %781 }
 0x163   : > { %v644_v57 = vpack.c.bf16 %v630_v55, %v628_v54 }
 0x165   : > { %683 = vmatprep.subr.bf16.mxu1 %v644_v57 }
 0x166   : > { %684 = vmatpush1.bf16.msra.mxu1 %v643_v56  ;;  %v876_v56 = vpop.permute.xlu0 %875 }
 0x169   : > { %1093 = vmatmul.mubr.msk.bf16.vlgmr.msra.gmra.mrb[0].mxu1 %vm507_vm0, %v1188_v58  ;;  %v881_v58 = vpop.permute.xlu1 %880 }
 0x16a   : > { %723 = vmatprep.mubr.bf16.mxu1 %v1392_v3 }
 0x171   : > { %1094 = vmatmul.mubr.msk.bf16.gmra.mrb[4].mxu1 %vm507_vm0, %v1189_v59 }
 0x172   : > { %832 = vmatprep.mubr.bf16.mxu1 %v1392_v3 }
 0x23c   : > { %v715_v61 = vpop.f32.mrb[0].mxu1 }
 0x23d   : > { %v716_v62 = vadd.f32 %v715_v61, %v648_v60  ;;  %v717_v63 = vpop.f32.mrb[1].mxu1 }
 0x23e   : > { %v718_v2 = vadd.f32 %v717_v63, %v648_v60  ;;  %v719_v4 = vpop.f32.mrb[2].mxu1 }
 0x23f   : > { %v734_v5 = vmul.f32 0.01, %v716_v62  ;;  %v720_v6 = vadd.f32 %v719_v4, %v653_v0  ;;  %v721_v7 = vpop.f32.mrb[3].mxu1 }
 0x240   : > { %v735_v8 = vmul.f32 0.01, %v718_v2  ;;  %v722_v9 = vadd.f32 %v721_v7, %v653_v0 }
 0x241   : > { %v736_v10 = vmul.f32 0.01, %v720_v6  ;;  %v742_v12 = vmax.f32 %v716_v62, %v734_v5 }
 0x242   : > { %v737_v11 = vmul.f32 0.01, %v722_v9  ;;  %v743_v15 = vmax.f32 %v718_v2, %v735_v8 }
 0x243   : > { %v744_v13 = vmax.f32 %v720_v6, %v736_v10 }
 0x244   : > { %v745_v16 = vmax.f32 %v722_v9, %v737_v11  ;;  %v725_v17 = vpop.f32.mrb[4].mxu1 }
 0x245   : > { %v760_v18 = vpack.c.bf16 %v744_v13, %v742_v12  ;;  %v726_v19 = vadd.f32 %v725_v17, %v658_v14  ;;  %v727_v20 = vpop.f32.mrb[5].mxu1 }
 0x246   : > { %v728_v22 = vadd.f32 %v727_v20, %v658_v14  ;;  %v729_v23 = vpop.f32.mrb[6].mxu1  ;;  %v761_v24 = vpack.c.bf16 %v745_v16, %v743_v15  ;;  %v886_v16 = vpop.permute.xlu0 %885 }
 0x247   : > { %v738_v25 = vmul.f32 0.01, %v726_v19  ;;  %v730_v26 = vadd.f32 %v729_v23, %v663_v21  ;;  %v731_v27 = vpop.f32.mrb[7].mxu1 }
 0x248   : > { %v739_v28 = vmul.f32 0.01, %v728_v22  ;;  %v732_v29 = vadd.f32 %v731_v27, %v663_v21  ;;  %800 = vmatprep.subr.bf16.mxu1 %v761_v24  ;;  %v891_v21 = vpop.permute.xlu1 %890 }
 0x249   : > { %v740_v30 = vmul.f32 0.01, %v730_v26  ;;  %801 = vmatpush1.bf16.msra.mxu1 %v760_v18  ;;  %v746_v32 = vmax.f32 %v726_v19, %v738_v25 }
 0x24a   : > { %v741_v31 = vmul.f32 0.01, %v732_v29  ;;  %v747_v1 = vmax.f32 %v728_v22, %v739_v28  ;;  %v925_v28 = vlaneseq }
 0x24b   : > { %v748_v33 = vmax.f32 %v730_v26, %v740_v30 }
 0x24c   : > { %v749_v34 = vmax.f32 %v732_v29, %v741_v31  ;;  %vm963_vm1 = vcmp.lt.s32.totalorder %v925_v28, 256 }
 0x24d   : > { %v762_v35 = vpack.c.bf16 %v748_v33, %v746_v32  ;;  %v926_v33 = vshrl.u32 %v925_v28, 7 }
 0x24e   : > { %v763_v36 = vpack.c.bf16 %v749_v34, %v747_v1 }
 0x250   : > { %802 = vmatprep.subr.bf16.mxu1 %v763_v36 }
 0x251   : > { %803 = vmatpush1.bf16.msra.mxu1 %v762_v35 }
 0x254   : > { %1105 = vmatmul.mubr.msk.bf16.vlgmr.msra.gmra.mrb[8].mxu1 %vm507_vm0, %v1190_v37  ;;  %v927_v37 = vsub.s32 0, %v926_v33 }
 0x255   : > { %842 = vmatprep.mubr.bf16.mxu1 %v1392_v3 }
 0x25c   : > { %1106 = vmatmul.mubr.msk.bf16.gmra.mrb[12].mxu1 %vm507_vm0, %v1191_v38 }
 0x327   : > { %v834_v41 = vpop.f32.mrb[8].mxu1 }
 0x328   : > { %v835_v43 = vadd.f32 %v834_v41, %v767_v39  ;;  %v836_v44 = vpop.f32.mrb[9].mxu1 }
 0x329   : > { %v837_v46 = vadd.f32 %v836_v44, %v767_v39  ;;  %v838_v47 = vpop.f32.mrb[10].mxu1  ;;  %v923_v39 = vpop.permute.xlu0 %922 }
 0x32a   : > { %v853_v48 = vmul.f32 0.01, %v835_v43  ;;  %v839_v49 = vadd.f32 %v838_v47, %v772_v40  ;;  %v840_v50 = vpop.f32.mrb[11].mxu1 }
 0x32b   : > { %v854_v51 = vmul.f32 0.01, %v837_v46  ;;  %v841_v3 = vadd.f32 %v840_v50, %v772_v40 }
 0x32c   : > { %v861_v52 = vmax.f32 %v835_v43, %v853_v48  ;;  %v855_v53 = vmul.f32 0.01, %v839_v49  ;;  %v928_v43 = vrot.slane %v923_v39, %v927_v37 }
 0x32d   : > { %v862_v54 = vmax.f32 %v837_v46, %v854_v51  ;;  %v856_v55 = vmul.f32 0.01, %v841_v3 }
 0x32e   : > { %v863_v57 = vmax.f32 %v839_v49, %v855_v53  ;;  %v893_v61 = vmul.f32 %v876_v56, %v861_v52  ;;  %v1393_v53 = vmov 1966171168  }
 0x32f   : > { %v864_v59 = vmax.f32 %v841_v3, %v856_v55  ;;  %v844_v60 = vpop.f32.mrb[12].mxu1  ;;  %v894_v2 = vmul.f32 %v876_v56, %v862_v54  ;;  %v947_v54 = vunpack.c.l.s4 %v1393_v53 }
 0x330   : > { %v895_v62 = vmul.f32 %v881_v58, %v863_v57  ;;  %v845_v63 = vadd.f32 %v844_v60, %v777_v42  ;;  %v846_v0 = vpop.f32.mrb[13].mxu1 }
 0x331   : > { %v896_v4 = vmul.f32 %v881_v58, %v864_v59  ;;  %v847_v5 = vadd.f32 %v846_v0, %v777_v42  ;;  %v848_v6 = vpop.f32.mrb[14].mxu1  ;;  %v948_v55 = vunpack.c.0.s8 %v947_v54 }
 0x332   : > { %v901_v7 = vadd.f32 %v895_v62, %v893_v61  ;;  %v857_v8 = vmul.f32 0.01, %v845_v63  ;;  %v849_v9 = vadd.f32 %v848_v6, %v782_v45  ;;  %v850_v10 = vpop.f32.mrb[15].mxu1 }
 0x333   : > { %v910_v11 = vadd.f32 %v896_v4, %v894_v2  ;;  %v858_v12 = vmul.f32 0.01, %v847_v5  ;;  %v851_v13 = vadd.f32 %v850_v10, %v782_v45  ;;  %v951_v57 = vsub.s32 %v948_v55, %v926_v33 }
 0x334   : > { %v865_v14 = vmax.f32 %v845_v63, %v857_v8  ;;  %v859_v15 = vmul.f32 0.01, %v849_v9 }
 0x335   : > { %v866_v17 = vmax.f32 %v847_v5, %v858_v12  ;;  %v860_v18 = vmul.f32 0.01, %v851_v13 }
 0x336   : > { %v897_v19 = vmul.f32 %v886_v16, %v865_v14  ;;  %v867_v20 = vmax.f32 %v849_v9, %v859_v15 }
 0x337   : > { %v898_v22 = vmul.f32 %v886_v16, %v866_v17  ;;  %v868_v23 = vmax.f32 %v851_v13, %v860_v18 }
 0x338   : > { %v902_v24 = vadd.f32 %v901_v7, %v897_v19  ;;  %v899_v25 = vmul.f32 %v891_v21, %v867_v20 }
 0x339   : > { %v911_v26 = vadd.f32 %v910_v11, %v898_v22  ;;  %v900_v27 = vmul.f32 %v891_v21, %v868_v23 }
 0x33a   : > { %v903_v29 = vadd.f32 %v902_v24, %v899_v25 }
 0x33b   : > { %v912_v30 = vadd.f32 %v911_v26, %v900_v27 }
 0x33c   : > { %v904_v31 = vrot.slane %v903_v29, 4 }
 0x33d   : > { %v913_v32 = vrot.slane %v912_v30, 4 }
 0x33e   : > { %v905_v1 = vadd.f32 %v904_v31, %v903_v29 }
 0x33f   : > { %v914_v34 = vadd.f32 %v913_v32, %v912_v30 }
 0x340   : > { %v906_v35 = vrot.slane %v905_v1, 2 }
 0x341   : > { %v915_v36 = vrot.slane %v914_v34, 2 }
 0x342   : > { %v907_v38 = vadd.f32 %v906_v35, %v905_v1 }
 0x343   : > { %v916_v40 = vadd.f32 %v915_v36, %v914_v34 }
 0x344   : > { %v908_v41 = vrot.slane %v907_v38, 1 }
 0x345   : > { %v917_v42 = vrot.slane %v916_v40, 1 }
 0x346   : > { %v909_v44 = vadd.f32 %v908_v41, %v907_v38 }
 0x347   : > { %v918_v45 = vadd.f32 %v917_v42, %v916_v40 }
 0x348   : > { %v929_v46 = vadd.f32 %v928_v43, %v909_v44 }
 0x349   : > { %v930_v47 = vadd.f32 %v928_v43, %v918_v45 }
 0x34a   : > { %v1107_v48 = vmul.f32 -1.442695, %v929_v46 }
 0x34b   : > { %v1108_v49 = vmul.f32 -1.442695, %v930_v47 }
 0x34c   : > { %1320 = vpow2.f32 %v1107_v48 }
 0x34d   : > { %1322 = vpow2.f32 %v1108_v49 }
 0x356   : > { %v1321_v50 = vpop.eup %1320 }
 0x357   : > { %v1323_v51 = vpop.eup %1322  ;;  %v937_v3 = vadd.f32 1.0, %v1321_v50 }
 0x358   : > { %v938_v52 = vadd.f32 1.0, %v1323_v51 }
 0x359   : > { %1324 = vrcp.f32 %v937_v3 }
 0x35a   : > { %1326 = vrcp.f32 %v938_v52 }
 0x363   : > { %v1325_v56 = vpop.eup %1324 }
 0x364   : > { %v1327_v58 = vpop.eup %1326 }
 0x365   : > { %v945_v59 = vcombine.low %v1325_v56, %v1327_v58 }
 0x367   : > { %v952_v60 = vrot.slane %v945_v59, %v951_v57 }
 0x369   : > { %v959_v61 = vrot.slane %v952_v60, %v951_v57 }
 0x36b   : > { %965 = vst.msk [vmem:[%s220_s8] sm:$0x3] %vm963_vm1, %v959_v61 }
 0x36c   : > { %1341 = shalt.err (!%p1338_p3)
}
 0x36d   : > { %s1342_s6 = scalar_lea.hbm %s1619_s12, 32  ;;  %s1346_s4 = scalar_lea.hbm %s1666_s5, 96 }
 0x36e   : > { %p1343_p4 = scmp.ne.s32.totalorder %s1619_s12, %s1342_s6  ;;  %p1347_p9 = scmp.lt.u32.totalorder %s1619_s12, %s1666_s5 }
 0x36f   : > { %p1348_p10 = scmp.lt.u32.totalorder %s1346_s4, %s1342_s6  ;;  %p1350_p12 = scmp.lt.u32.totalorder %s1342_s6, %s1619_s12 }
 0x370   : > { %p1344_p7 = pnand %p1343_p4, %p1463_p5 }
 0x371   : > { %p1349_p11 = por %p1348_p10, %p1347_p9 }
 0x372   : > { %p1345_p8 = pneg %p1344_p7 }
 0x373   : > { %p1351_p13 = por %p1350_p12, %p1349_p11 }
 0x375   : > { %p1352_p0 = pnand %p1351_p13, %p1345_p8 }
 0x377   : > { %1355 = shalt.err (!%p1352_p0)
}
 0x378   : > { %1143 = dma.vmem_to_hbm [thread:$0]  (%p1463_p5), %s1621_s9, 32, %s1619_s12, %s967_s19  }
 0x379 PF: > { %p1149_p1 = scmp.ge.s32.totalorder %s1390_s23, 2  ;;  %s993_s27 = sand.u32 1, %s1378_s20  }
 0x37a   : > { %s994_s7 = scalar_lea.sflag [#allocation4], %s993_s27 }
 0x37b   : > { %p1146_p2 = pnand %p1149_p1, %p1467_p6 }
 0x37d   : > { %1373 = dma.done.wait (!%p1146_p2), %s994_s7, 32  }
 0x37e   : > { %1375 = vsyncadd (!%p1146_p2), %s994_s7, 4294967264  ;;  %p17_p3 = scmp.ge.s32.totalorder %s1451_s25, 5   ;;  %s1669_s20 = smov %s1382_s21 }
 0x37f   : > { %s1670_s21 = smov %s1386_s22  ;;  %s1671_s22 = smov %s1461_s28 }
 0x380   : > { %s1672_s23 = smov %s1451_s25  ;;  %19 = sbr.rel (!%p17_p3) target bundleno = 6 (0x6), region = 79 }
 0x387   :  { %999 = vsyncpa [#allocation4], 1 }
 0x388   :  { %1001 = vsyncpa [#allocation4 + $0x1], 1 }

</bundles_post_ra>
